<compile_context>
chip_gen: v5e
topology: v5e:2x2
jax: 0.10.0
libtpu: 0.0.40
codegen_flags: <defaults>
</compile_context>

<pallas_src>
import math
import jax
import jax.numpy as jnp
from jax import lax
from jax.experimental import pallas as pl
from jax.experimental.pallas import tpu as pltpu


def make_attn_kernel(is_causal):
    """Per-(batch, head) attention step.

    Refs:
      q_ref    (1, T_q, D)      query activations for this batch element
      kv_ref   (1, T_kv, D)     key/value activations for this batch element
      mask_ref (1, 1, T_kv)     kv padding mask (1.0 = keep, 0.0 = mask)
      wq_ref   (1, D, HD)       per-head Wq slice, [in, out], scale pre-folded
      wk_ref   (1, D, HD)       per-head Wk slice, [in, out]
      wv_ref   (1, D, HD)       per-head Wv slice, [in, out]
      yt_ref   (1, 1, HD, T_q)  per-head output, already in the scrambled
                                (transpose(2,3)) layout the o-proj consumes
    """

    def kernel(q_ref, kv_ref, mask_ref, wq_ref, wk_ref, wv_ref, yt_ref):
        x_q = q_ref[0]                      # (T_q, D)
        x_kv = kv_ref[0]                    # (T_kv, D)
        wq = wq_ref[0]                      # (D, HD)
        wk = wk_ref[0]
        wv = wv_ref[0]

        # Per-head projections: full-width (D) contraction on the MXU,
        # no weight transpose needed (weights already [in, out]).
        qh = jnp.dot(x_q, wq, preferred_element_type=jnp.float32)   # (T_q, HD)
        kh = jnp.dot(x_kv, wk, preferred_element_type=jnp.float32)  # (T_kv, HD)
        vh = jnp.dot(x_kv, wv, preferred_element_type=jnp.float32)  # (T_kv, HD)

        # Scores = qh @ kh^T without materializing an explicit transpose
        # (scale is already folded into Wq in the wrapper).
        s = lax.dot_general(qh, kh, (((1,), (1,)), ((), ())),
                            preferred_element_type=jnp.float32)     # (T_q, T_kv)

        T_q, T_kv = s.shape
        neg = jnp.float32(-1e30)            # finite fill: no NaN on fully-masked rows

        pad = mask_ref[0]                   # (1, T_kv), broadcasts over query rows
        s = jnp.where(pad != 0.0, s, neg)

        if is_causal:
            row = lax.broadcasted_iota(jnp.int32, (T_q, T_kv), 0)
            col = lax.broadcasted_iota(jnp.int32, (T_q, T_kv), 1)
            s = jnp.where(row >= col, s, neg)

        # Softmax along the kv axis; divide goes to the EUP via approx recip.
        s_max = jnp.max(s, axis=-1, keepdims=True)
        p = jnp.exp(s - s_max)
        denom = jnp.sum(p, axis=-1, keepdims=True)
        p = p * pl.reciprocal(denom, approx=True)

        yh = jnp.dot(p, vh, preferred_element_type=jnp.float32)     # (T_q, HD)

        # Store transposed (HD, T_q): this is exactly the layout PyTorch's
        # transpose(2,3).view quirk reads, so the wrapper reshape is free.
        yt_ref[0, 0] = yh.T.astype(yt_ref.dtype)

    return kernel


def oproj_kernel(y_ref, wot_ref, o_ref):
    # y_ref (bm, D), wot_ref (D, D) = Wo^T [in, out], o_ref (bm, D)
    o_ref[...] = jnp.dot(y_ref[...], wot_ref[...],
                         preferred_element_type=jnp.float32).astype(o_ref.dtype)


def multi_head_attention(q_raw, kv_raw, wq, wk, wv, wo, n_head,
                         kv_padding_mask=None, is_causal_mask=False):
    B, T_q, D = q_raw.shape
    _, T_kv, _ = kv_raw.shape
    assert not (T_kv != T_q and is_causal_mask), "causal mask requires self-attention"
    H = n_head
    HD = D // H
    scale = 1.0 / math.sqrt(D / H)

    # One-time wrapper-side weight prep (XLA ops, outside the kernels):
    # transpose to [in, out], split the out axis per head -> (H, D, HD).
    def per_head(w, s=1.0):
        return (w.T * s).reshape(D, H, HD).transpose(1, 0, 2)

    wq_h = per_head(wq, scale)     # scale folded into Wq
    wk_h = per_head(wk)
    wv_h = per_head(wv)
    wo_t = wo.T                    # (D, D), [in, out]

    if kv_padding_mask is None:
        mask = jnp.ones((B, 1, T_kv), jnp.float32)        # all-ones == no masking
    else:
        mask = kv_padding_mask.astype(jnp.float32).reshape(B, 1, T_kv)

    # ---- Kernel 1: QKV projections + attention, grid over (batch, head) ----
    yt = pl.pallas_call(
        make_attn_kernel(is_causal_mask),
        out_shape=jax.ShapeDtypeStruct((B, H, HD, T_q), jnp.float32),
        grid=(B, H),
        in_specs=[
            pl.BlockSpec((1, T_q, D), lambda b, h: (b, 0, 0)),
            pl.BlockSpec((1, T_kv, D), lambda b, h: (b, 0, 0)),
            pl.BlockSpec((1, 1, T_kv), lambda b, h: (b, 0, 0)),
            pl.BlockSpec((1, D, HD), lambda b, h: (h, 0, 0)),
            pl.BlockSpec((1, D, HD), lambda b, h: (h, 0, 0)),
            pl.BlockSpec((1, D, HD), lambda b, h: (h, 0, 0)),
        ],
        out_specs=pl.BlockSpec((1, 1, HD, T_q), lambda b, h: (b, h, 0, 0)),
        compiler_params=pltpu.CompilerParams(
            dimension_semantics=("parallel", "parallel"),
            vmem_limit_bytes=64 * 1024 * 1024),
    )(q_raw, kv_raw, mask, wq_h, wk_h, wv_h)

    # PyTorch quirk `y.transpose(2,3).contiguous().view(B, T_q, -1)`:
    # yt is already (B, H, HD, T_q) contiguous, so this is a pure row-major
    # reinterpretation — no data movement.
    y_scr = yt.reshape(B * T_q, D)

    # ---- Kernel 2: output projection, row-tiled with Wo^T resident ----
    M = B * T_q
    bm = M if M <= 512 else 512
    out2d = pl.pallas_call(
        oproj_kernel,
        out_shape=jax.ShapeDtypeStruct((M, D), jnp.float32),
        grid=(pl.cdiv(M, bm),),
        in_specs=[
            pl.BlockSpec((bm, D), lambda i: (i, 0)),
            pl.BlockSpec((D, D), lambda i: (0, 0)),
        ],
        out_specs=pl.BlockSpec((bm, D), lambda i: (i, 0)),
        compiler_params=pltpu.CompilerParams(
            dimension_semantics=("parallel",),
            vmem_limit_bytes=64 * 1024 * 1024),
    )(y_scr, wo_t)

    return out2d.reshape(B, T_q, D)


def reference_mha(q_raw, kv_raw, wq, wk, wv, wo, n_head,
                  kv_padding_mask=None, is_causal_mask=False):
    """Pure-JAX replica of the PyTorch forward, for verification."""
    B, T_q, D = q_raw.shape
    _, T_kv, _ = kv_raw.shape
    H = n_head
    HD = D // H
    q = q_raw @ wq.T
    k = kv_raw @ wk.T
    v = kv_raw @ wv.T
    q = q.reshape(B, T_q, H, HD).transpose(0, 2, 1, 3)
    k = k.reshape(B, T_kv, H, HD).transpose(0, 2, 1, 3)
    v = v.reshape(B, T_kv, H, HD).transpose(0, 2, 1, 3)
    s = jnp.einsum("bhqd,bhkd->bhqk", q, k) / math.sqrt(D / H)
    if is_causal_mask:
        causal = jnp.tril(jnp.ones((T_q, T_q)))
        s = jnp.where(causal == 0, -jnp.inf, s)
    if kv_padding_mask is not None:
        pm = kv_padding_mask[:, None, None, :]
        s = jnp.where(pm == 0, -jnp.inf, s)
    w = jax.nn.softmax(s, axis=-1)
    y = jnp.einsum("bhqk,bhkd->bhqd", w, v)
    # exact PyTorch quirk: transpose(2,3) then view(B, T_q, -1)
    y = y.transpose(0, 1, 3, 2).reshape(B, T_q, D)
    return y @ wo.T


if __name__ == "__main__":
    B, T, D, H = 2, 8, 32, 4   # batch, seq, d_model, n_head

    key = jax.random.PRNGKey(0)
    kq, kkv, k1, k2, k3, k4 = jax.random.split(key, 6)

    q_raw = jax.random.normal(kq, (B, T, D), jnp.float32)
    kv_raw = jax.random.normal(kkv, (B, T, D), jnp.float32)

    # Deterministic Linear weights, PyTorch layout (out, in)
    wq = jax.random.normal(k1, (D, D), jnp.float32) * 0.1
    wk = jax.random.normal(k2, (D, D), jnp.float32) * 0.1
    wv = jax.random.normal(k3, (D, D), jnp.float32) * 0.1
    wo = jax.random.normal(k4, (D, D), jnp.float32) * 0.1

    # Case 1: cross-attention style, no masks.
    out = multi_head_attention(q_raw, kv_raw, wq, wk, wv, wo, H,
                               kv_padding_mask=None, is_causal_mask=False)
    out = jax.block_until_ready(out)
    ref = reference_mha(q_raw, kv_raw, wq, wk, wv, wo, H,
                        kv_padding_mask=None, is_causal_mask=False)
    assert out.shape == (B, T, D)
    assert jnp.allclose(out, ref, atol=5e-3, rtol=5e-3), "mismatch (no mask)"

    # Case 2: self-attention with causal + kv padding masks.
    lengths = jnp.array([T, 5], jnp.int32)
    pad_mask = (jnp.arange(T)[None, :] < lengths[:, None]).astype(jnp.float32)
    out2 = multi_head_attention(q_raw, q_raw, wq, wk, wv, wo, H,
                                kv_padding_mask=pad_mask, is_causal_mask=True)
    out2 = jax.block_until_ready(out2)
    ref2 = reference_mha(q_raw, q_raw, wq, wk, wv, wo, H,
                         kv_padding_mask=pad_mask, is_causal_mask=True)
    assert jnp.allclose(out2, ref2, atol=5e-3, rtol=5e-3), "mismatch (masked)"

    print("KERNEL_OK")
</pallas_src>

<mosaic_0001>
module attributes {stable_mosaic.version = 11 : i64} {
  func.func @kernel(%arg0: i32, %arg1: i32, %arg2: memref<1x8x32xf32, #tpu.memory_space<vmem>>, %arg3: memref<1x8x32xf32, #tpu.memory_space<vmem>>, %arg4: memref<1x1x8xf32, #tpu.memory_space<vmem>>, %arg5: memref<1x32x8xf32, #tpu.memory_space<vmem>>, %arg6: memref<1x32x8xf32, #tpu.memory_space<vmem>>, %arg7: memref<1x32x8xf32, #tpu.memory_space<vmem>>, %arg8: memref<1x1x8x8xf32, #tpu.memory_space<vmem>>) attributes {dimension_semantics = [#tpu.dimension_semantics<parallel>, #tpu.dimension_semantics<parallel>], iteration_bounds = array<i64: 2, 4>, scalar_prefetch = 0 : i64, scratch_operands = 0 : i64, tpu.core_type = #tpu.core_type<tc>, window_params = [{transform_indices = @transform_0, window_bounds = array<i64: 1, 8, 32>}, {transform_indices = @transform_1, window_bounds = array<i64: 1, 8, 32>}, {transform_indices = @transform_2, window_bounds = array<i64: 1, 1, 8>}, {transform_indices = @transform_3, window_bounds = array<i64: 1, 32, 8>}, {transform_indices = @transform_4, window_bounds = array<i64: 1, 32, 8>}, {transform_indices = @transform_5, window_bounds = array<i64: 1, 32, 8>}, {transform_indices = @transform_6, window_bounds = array<i64: 1, 1, 8, 8>}]} {
    %c0 = arith.constant 0 : index
    %c0_0 = arith.constant 0 : index
    %c0_1 = arith.constant 0 : index
    %0 = vector.load %arg2[%c0, %c0_0, %c0_1] : memref<1x8x32xf32, #tpu.memory_space<vmem>>, vector<1x8x32xf32>
    %1 = vector.shape_cast %0 : vector<1x8x32xf32> to vector<8x32xf32>
    %c0_2 = arith.constant 0 : index
    %c0_3 = arith.constant 0 : index
    %c0_4 = arith.constant 0 : index
    %2 = vector.load %arg3[%c0_2, %c0_3, %c0_4] : memref<1x8x32xf32, #tpu.memory_space<vmem>>, vector<1x8x32xf32>
    %3 = vector.shape_cast %2 : vector<1x8x32xf32> to vector<8x32xf32>
    %c0_5 = arith.constant 0 : index
    %c0_6 = arith.constant 0 : index
    %c0_7 = arith.constant 0 : index
    %4 = vector.load %arg5[%c0_5, %c0_6, %c0_7] : memref<1x32x8xf32, #tpu.memory_space<vmem>>, vector<1x32x8xf32>
    %5 = vector.shape_cast %4 : vector<1x32x8xf32> to vector<32x8xf32>
    %c0_8 = arith.constant 0 : index
    %c0_9 = arith.constant 0 : index
    %c0_10 = arith.constant 0 : index
    %6 = vector.load %arg6[%c0_8, %c0_9, %c0_10] : memref<1x32x8xf32, #tpu.memory_space<vmem>>, vector<1x32x8xf32>
    %7 = vector.shape_cast %6 : vector<1x32x8xf32> to vector<32x8xf32>
    %c0_11 = arith.constant 0 : index
    %c0_12 = arith.constant 0 : index
    %c0_13 = arith.constant 0 : index
    %8 = vector.load %arg7[%c0_11, %c0_12, %c0_13] : memref<1x32x8xf32, #tpu.memory_space<vmem>>, vector<1x32x8xf32>
    %9 = vector.shape_cast %8 : vector<1x32x8xf32> to vector<32x8xf32>
    %cst = arith.constant dense<0.000000e+00> : vector<8x8xf32>
    %10 = tpu.matmul %1, %5, %cst {dimension_numbers = #tpu.dot_dimension_numbers<[1], [0], [0], [1], [0, 0, 1, 1], [], []>} : vector<8x32xf32>, vector<32x8xf32>, vector<8x8xf32> -> vector<8x8xf32>
    %cst_14 = arith.constant dense<0.000000e+00> : vector<8x8xf32>
    %11 = tpu.matmul %3, %7, %cst_14 {dimension_numbers = #tpu.dot_dimension_numbers<[1], [0], [0], [1], [0, 0, 1, 1], [], []>} : vector<8x32xf32>, vector<32x8xf32>, vector<8x8xf32> -> vector<8x8xf32>
    %cst_15 = arith.constant dense<0.000000e+00> : vector<8x8xf32>
    %12 = tpu.matmul %3, %9, %cst_15 {dimension_numbers = #tpu.dot_dimension_numbers<[1], [0], [0], [1], [0, 0, 1, 1], [], []>} : vector<8x32xf32>, vector<32x8xf32>, vector<8x8xf32> -> vector<8x8xf32>
    %cst_16 = arith.constant dense<0.000000e+00> : vector<8x8xf32>
    %13 = tpu.matmul %10, %11, %cst_16 {dimension_numbers = #tpu.dot_dimension_numbers<[1], [1], [0], [0], [0, 0, 1, 0], [], []>} : vector<8x8xf32>, vector<8x8xf32>, vector<8x8xf32> -> vector<8x8xf32>
    %c0_17 = arith.constant 0 : index
    %c0_18 = arith.constant 0 : index
    %c0_19 = arith.constant 0 : index
    %14 = vector.load %arg4[%c0_17, %c0_18, %c0_19] : memref<1x1x8xf32, #tpu.memory_space<vmem>>, vector<1x1x8xf32>
    %15 = vector.shape_cast %14 : vector<1x1x8xf32> to vector<1x8xf32>
    %cst_20 = arith.constant 0.000000e+00 : f32
    %16 = vector.broadcast %cst_20 : f32 to vector<1x8xf32>
    %17 = arith.cmpf one, %15, %16 : vector<1x8xf32>
    %cst_21 = arith.constant -1.000000e+30 : f32
    %18 = vector.shape_cast %17 : vector<1x8xi1> to vector<1x8xi1>
    %19 = vector.broadcast %18 : vector<1x8xi1> to vector<8x8xi1>
    %20 = vector.broadcast %cst_21 : f32 to vector<8x8xf32>
    %21 = arith.select %19, %13, %20 : vector<8x8xi1>, vector<8x8xf32>
    %cst_22 = arith.constant dense<0xFF800000> : vector<8xf32>
    %22 = vector.multi_reduction <maximumf>, %21, %cst_22 [1] : vector<8x8xf32> to vector<8xf32>
    %23 = vector.shape_cast %22 : vector<8xf32> to vector<8x1xf32>
    %24 = vector.broadcast %23 : vector<8x1xf32> to vector<8x8xf32>
    %25 = arith.subf %21, %24 : vector<8x8xf32>
    %26 = math.exp %25 : vector<8x8xf32>
    %cst_23 = arith.constant dense<0.000000e+00> : vector<8xf32>
    %27 = vector.multi_reduction <add>, %26, %cst_23 [1] : vector<8x8xf32> to vector<8xf32>
    %28 = vector.shape_cast %27 : vector<8xf32> to vector<8x1xf32>
    %29 = tpu.reciprocal %28 {approx = true} : vector<8x1xf32> -> vector<8x1xf32>
    %30 = vector.broadcast %29 : vector<8x1xf32> to vector<8x8xf32>
    %31 = arith.mulf %26, %30 : vector<8x8xf32>
    %cst_24 = arith.constant dense<0.000000e+00> : vector<8x8xf32>
    %32 = tpu.matmul %31, %12, %cst_24 {dimension_numbers = #tpu.dot_dimension_numbers<[1], [0], [0], [1], [0, 0, 1, 1], [], []>} : vector<8x8xf32>, vector<8x8xf32>, vector<8x8xf32> -> vector<8x8xf32>
    %33 = tpu.transpose %32, [1, 0] : vector<8x8xf32> -> vector<8x8xf32>
    %c0_25 = arith.constant 0 : index
    %c0_26 = arith.constant 0 : index
    %c0_27 = arith.constant 0 : index
    %c0_28 = arith.constant 0 : index
    %34 = vector.load %arg8[%c0_25, %c0_26, %c0_27, %c0_28] : memref<1x1x8x8xf32, #tpu.memory_space<vmem>>, vector<1x1x8x8xf32>
    %35 = vector.shape_cast %34 : vector<1x1x8x8xf32> to vector<8x8xf32>
    %36 = vector.shape_cast %33 : vector<8x8xf32> to vector<1x1x8x8xf32>
    tpu.vector_store %arg8[%c0_25, %c0_26, %c0_27, %c0_28], %36 {strides = array<i32>} : memref<1x1x8x8xf32, #tpu.memory_space<vmem>>, vector<1x1x8x8xf32>,
    return
  }
  func.func @transform_0(%arg0: i32, %arg1: i32) -> (i32, i32, i32) {
    %c0_i32 = arith.constant 0 : i32
    %c0_i32_0 = arith.constant 0 : i32
    %c0_i32_1 = arith.constant 0 : i32
    return %arg0, %c0_i32, %c0_i32_0 : i32, i32, i32
  }
  func.func @transform_1(%arg0: i32, %arg1: i32) -> (i32, i32, i32) {
    %c0_i32 = arith.constant 0 : i32
    %c0_i32_0 = arith.constant 0 : i32
    %c0_i32_1 = arith.constant 0 : i32
    return %arg0, %c0_i32, %c0_i32_0 : i32, i32, i32
  }
  func.func @transform_2(%arg0: i32, %arg1: i32) -> (i32, i32, i32) {
    %c0_i32 = arith.constant 0 : i32
    %c0_i32_0 = arith.constant 0 : i32
    %c0_i32_1 = arith.constant 0 : i32
    return %arg0, %c0_i32, %c0_i32_0 : i32, i32, i32
  }
  func.func @transform_3(%arg0: i32, %arg1: i32) -> (i32, i32, i32) {
    %c0_i32 = arith.constant 0 : i32
    %c0_i32_0 = arith.constant 0 : i32
    %c0_i32_1 = arith.constant 0 : i32
    return %arg1, %c0_i32, %c0_i32_0 : i32, i32, i32
  }
  func.func @transform_4(%arg0: i32, %arg1: i32) -> (i32, i32, i32) {
    %c0_i32 = arith.constant 0 : i32
    %c0_i32_0 = arith.constant 0 : i32
    %c0_i32_1 = arith.constant 0 : i32
    return %arg1, %c0_i32, %c0_i32_0 : i32, i32, i32
  }
  func.func @transform_5(%arg0: i32, %arg1: i32) -> (i32, i32, i32) {
    %c0_i32 = arith.constant 0 : i32
    %c0_i32_0 = arith.constant 0 : i32
    %c0_i32_1 = arith.constant 0 : i32
    return %arg1, %c0_i32, %c0_i32_0 : i32, i32, i32
  }
  func.func @transform_6(%arg0: i32, %arg1: i32) -> (i32, i32, i32, i32) {
    %c0_i32 = arith.constant 0 : i32
    %c0_i32_0 = arith.constant 0 : i32
    %c0_i32_1 = arith.constant 0 : i32
    return %arg0, %arg1, %c0_i32, %c0_i32_0 : i32, i32, i32, i32
  }
}

</mosaic_0001>

<bundles_post_ra>
// kernel: tpu_custom_call.1
= control target key start
LH: loop header
LB: loop body
LE: loop exit
PB: predicated region body
PF: predicated region fallthrough
CT: control target
= control target key end

     0   :  { %s1072_s0 = inlined_call_operand.vmem [shape: f32[2,8,32], index: 0, kind: input, shape index: {}]   ;;  %s1073_s1 = inlined_call_operand.vmem [shape: f32[2,8,32], index: 1, kind: input, shape index: {}]   ;;  %s1074_s2 = inlined_call_operand.vmem [shape: f32[2,1,8], index: 2, kind: input, shape index: {}]   ;;  %s1075_s3 = inlined_call_operand.vmem [shape: f32[4,32,8], index: 3, kind: input, shape index: {}]   ;;  %s1076_s4 = inlined_call_operand.vmem [shape: f32[4,32,8], index: 4, kind: input, shape index: {}]   ;;  %s1077_s5 = inlined_call_operand.vmem [shape: f32[4,32,8], index: 5, kind: input, shape index: {}]   ;;  %s1078_s6 = inlined_call_operand.hbm [shape: f32[2,4,8,8], index: 6, kind: output, shape index: {}]  }
   0x1   :  { %1080 = sst [smem:[#allocation6_spill]] %s1076_s4 }
   0x2   :  { %11 = vsyncpa [#allocation3], 0 }
   0x3   :  { %13 = vsyncpa [#allocation3 + $0x1], 0  ;;  %s917_s21 = smov 0   ;;  %s919_s22 = smov 0  }
   0x4   :  { %s921_s23 = smov 0   ;;  %s923_s24 = smov 0  }
   0x5   :  { %s925_s25 = smov 0   ;;  %s927_s26 = smov 0  }
   0x6   :  { %s929_s27 = smov 0   ;;  %s931_s28 = smov 0  }
   0x7 LB: > { %s680_s29 = sadd.s32 4294967295, %s879_s28   ;;  %s681_s30 = sadd.s32 4294967294, %s879_s28   ;;  %s879_s28 = sphi %s931_s28, %s19_s28   ;;  %s875_s27 = sphi %s929_s27, %s1092_s27   ;;  %s871_s26 = sphi %s927_s26, %s1091_s26   ;;  %s867_s25 = sphi %s925_s25, %s1090_s25   ;;  %s863_s24 = sphi %s923_s24, %s1089_s24   ;;  %s859_s23 = sphi %s921_s23, %s1088_s23   ;;  %s855_s22 = sphi %s919_s22, %s1087_s22   ;;  %s851_s21 = sphi %s917_s21, %s1086_s21  }
   0x8   : > { %s28_s7 = sadd.s32 1, %s871_s26  ;;  %s31_s8 = sadd.s32 1, %s875_s27 }
   0x9   : > { %p29_p0 = scmp.ge.s32.totalorder %s28_s7, 4  ;;  %p206_p1 = scmp.ne.s32.totalorder %s859_s23, %s855_s22 }
   0xa   : > { %p207_p2 = scmp.eq.s32.totalorder %s680_s29, 7  ;;  %p212_p5 = scmp.ne.s32.totalorder %s855_s22, %s851_s21 }
   0xb   : > { %s1094_s7 = smov (%p29_p0, %s28_s7), 0  ;;  %s1096_s8 = smov (!%p29_p0, %s31_s8), %s875_s27 }
   0xc   : > { %s192_s9 = ssub.s32 %s871_s26, %s1094_s7  ;;  %p968_p3 = por %p207_p2, %p206_p1 }
   0xd   : > { %p33_p4 = scmp.ge.s32.totalorder %s1096_s8, 2  ;;  %p213_p6 = scmp.eq.s32.totalorder %s681_s30, 7 }
   0xe   : > { %p684_p7 = scmp.ge.s32.totalorder %s879_s28, 1  ;;  %p275_p9 = scmp.lt.s32.totalorder %s879_s28, 9 }
   0xf   : > { %s1098_s8 = smov (%p33_p4, %s1096_s8), 0  ;;  %p977_p8 = por %p213_p6, %p212_p5 }
  0x10   : > { %1082 = sst [smem:[#allocation5_spill]] %s1098_s8  ;;  %s191_s12 = ssub.s32 %s875_s27, %s1098_s8 }
  0x11   : > { %s196_s13 = sadd.s32 1, %s859_s23  ;;  %s193_s14 = sor.u32 %s192_s9, %s191_s12 }
  0x12   : > { %p276_p10 = pnand %p684_p7, %p275_p9  ;;  %p194_p11 = scmp.eq.s32.totalorder %s193_s14, 0 }
  0x13   : > { %p337_p12 = scmp.lt.s32.totalorder (!%p276_p10), %s863_s24, 3  ;;  %p326_p13 = scmp.lt.s32.totalorder (!%p276_p10), %s867_s25, 1 }
  0x14   : > { %s986_s15 = scalar_select %p194_p11, %s859_s23, %s196_s13  }
  0x15   : > { %279 = sbr.rel (%p276_p10) target bundleno = 854 (0x356), region = 44  ;;  %s1084_s4 = sld [smem:[#allocation6_spill]] (!%p276_p10) }
  0x1a   : > { %s338_s16 = scalar_select %p337_p12, %s863_s24, 3  ;;  %vm366_vm0 = vcmask 261120   ;;  %vm433_vm1 = vcmask 64512   ;;  %v881_v17 = vmov 0  }
  0x1b   : > { %s992_s17 = scalar_select %p326_p13, %s867_s25, 1 }
  0x1c   : > { %s994_s18 = sshll.u32 %s338_s16, 5 }
  0x1d   : > { %s346_s29 = scalar_lea.vmem %s1084_s4, %s994_s18  ;;  %s341_s12 = scalar_lea.vmem %s1075_s3, %s994_s18 }
  0x1e   : > { %v361_v0 = vld [vmem:[%s346_s29 + $0x18] sm:$0xff]  ;;  %v360_v1 = vld [vmem:[%s346_s29 + $0x10] sm:$0xff]  ;;  %s686_s13 = sshll.u32 %s992_s17, 3  ;;  %v359_v4 = vld [vmem:[%s346_s29 + $0x8] sm:$0xff] }
  0x1f   : > { %v357_v2 = vld [vmem:[%s341_s12 + $0x18] sm:$0xff]  ;;  %405 = vmatpush.msra.mxu1 %v361_v0  ;;  %v356_v3 = vld [vmem:[%s341_s12 + $0x10] sm:$0xff]  ;;  %v355_v5 = vld [vmem:[%s341_s12 + $0x8] sm:$0xff]  ;;  %s333_s8 = scalar_lea.vmem %s1073_s1, %s686_s13  ;;  %s329_s4 = scalar_lea.vmem %s1072_s0, %s686_s13 }
  0x20   : > { %382 = vmatpush.msra.mxu0 %v357_v2  ;;  %v358_v6 = vld [vmem:[%s346_s29] sm:$0xff] }
  0x21   : > { %406 = vmatpush.msra.mxu1 %v360_v1  ;;  %v354_v7 = vld [vmem:[%s341_s12] sm:$0xff]  ;;  %s336_s12 = scalar_lea.vmem %s1074_s2, %s992_s17  ;;  %s701_s17 = sshll.u32 %s867_s25, 2 }
  0x22   : > { %383 = vmatpush.msra.mxu0 %v356_v3  ;;  %v353_v8 = vld [vmem:[%s333_s8] sm:$0xff]  ;;  %s351_s8 = scalar_lea.vmem %s1077_s5, %s994_s18  ;;  %s323_s18 = sand.u32 1, %s855_s22  }
  0x23   : > { %407 = vmatpush.msra.mxu1 %v359_v4  ;;  %v352_v9 = vld [vmem:[%s329_s4] sm:$0xff]  ;;  %v365_v12 = vld [vmem:[%s351_s8 + $0x18] sm:$0xff]  ;;  %v364_v13 = vld [vmem:[%s351_s8 + $0x10] sm:$0xff]  ;;  %s544_s13 = sadd.s32 %s863_s24, %s701_s17  ;;  %s685_s14 = sshll.u32 %s323_s18, 3 }
  0x24   : > { %384 = vmatpush.msra.mxu0 %v355_v5  ;;  %425 = vmatpush.msra.mxu2 %v365_v12  ;;  %v363_v14 = vld [vmem:[%s351_s8 + $0x8] sm:$0xff]  ;;  %v362_v15 = vld [vmem:[%s351_s8] sm:$0xff]  ;;  %s702_s16 = sshll.u32 %s544_s13, 3  ;;  %s325_s30 = scalar_lea.vmem [#allocation2], %s685_s14 }
  0x25   : > { %408 = vmatpush.msra.mxu1 %v358_v6  ;;  %v460_v16 = vld [vmem:[%s336_s12] sm:$0x1]  ;;  %s546_s29 = scalar_lea.hbm %s1078_s6, %s702_s16  ;;  %s548_s8 = sshll.u32 %s325_s30, 4  ;;  %s549_s8 = int_to_ptr.vmem [resolvable:$true] %s548_s8 }
  0x26   : > { %385 = vmatpush.msra.mxu0 %v354_v7  ;;  %695 = vmatmul.msk.f32.vlgmr.msra.gmra.mxu1 %vm366_vm0, %v353_v8  ;;  %vm461_vm2 = vcmp.ne.f32.partialorder %v460_v16, 0.0  ;;  %s550_s4 = sshll.u32 %s546_s29, 4  ;;  %s534_s9 = scalar_lea.sflag [#allocation3], %s323_s18  ;;  %s551_s4 = int_to_ptr.hbm [resolvable:$true] %s550_s4 }
  0x27   : > { %694 = vmatmul.msk.f32.vlgmr.msra.gmra.mxu0 %vm366_vm0, %v352_v9  ;;  %426 = vmatpush.msra.mxu2 %v364_v13  ;;  %v462_v18 = vsel %vm461_vm2, 1, %v881_v17  ;;  %s799_s12 = sshra.s32 %s551_s4, 4  ;;  %s805_s13 = scalar_lea.hbm %s1078_s6, 64  ;;  %s800_s12 = int_to_ptr.hbm [resolvable:$true] %s799_s12 }
  0x28   : > { %v463_v19 = vperm.slane %v462_v18, 0  ;;  %s801_s25 = scalar_lea.hbm %s800_s12, 8  ;;  %p806_p4 = scmp.lt.s32.totalorder %s800_s12, %s1078_s6 }
  0x29   : > { %427 = vmatpush.msra.mxu2 %v363_v14  ;;  %p802_p0 = scmp.ne.s32.totalorder %s800_s12, %s801_s25  ;;  %p807_p5 = scmp.lt.s32.totalorder %s805_s13, %s801_s25 }
  0x2a   : > { %vm464_vm3 = vcmp.eq.s32.totalorder %v463_v19, 1 }
  0x2b   : > { %428 = vmatpush.msra.mxu2 %v362_v15  ;;  %p803_p1 = pnand %p802_p0, %p968_p3  ;;  %p808_p6 = por %p807_p5, %p806_p4 }
  0x2c   : > { %696 = vmatmul.msk.f32.vlgmr.msra.gmra.mxu2 %vm366_vm0, %v353_v8 }
  0x2d   : > { %p804_p2 = pneg %p803_p1 }
  0x2f   : > { %p809_p7 = pnand %p808_p6, %p804_p2 }
  0xa3   : > { %v410_v10 = vpop.f32.mrf.mxu1 }
  0xa4   : > { %697 = vmatpush.xpose.msk.msra.mxu3 %vm433_vm1, %v410_v10  ;;  %v387_v11 = vpop.f32.mrf.mxu0 }
  0xa7   : > { %698 = vmatmul.msk.f32.vlgmr.msra.gmra.mxu3 %vm433_vm1, %v387_v11 }
  0xaf   : > { %v430_v28 = vpop.f32.mrf.mxu2 }
  0xb0   : > { %495 = vmatpush.msrb.mxu3 %v430_v28 }
 0x12a   : > { %v457_v20 = vpop.f32.mrf.mxu3 }
 0x12b   : > { %v465_v21 = vsel %vm464_vm3, %v457_v20, -1e+30 }
 0x12c   : > { %v466_v22 = vsel %vm433_vm1, %v465_v21, -inf }
 0x12d   : > { %467 = vmax.xlane.f32.xlu0 %v466_v22 }
 0x1a0   : > { %v468_v23 = vpop.xlane.xlu0 %467 }
 0x1a1   : > { %v469_v24 = vsub.f32 %v465_v21, %v468_v23 }
 0x1a3   : > { %v470_v25 = vmul.f32 1.442695, %v469_v24 }
 0x1a5   : > { %781 = vpow2.f32 %v470_v25 }
 0x1ab   : > { %v782_v26 = vpop.eup %781 }
 0x1ac   : > { %v472_v27 = vsel %vm433_vm1, %v782_v26, 0.0 }
 0x1ad   : > { %473 = vadd.xlane.f32.xlu0 %v472_v27 }
 0x220   : > { %v474_v29 = vpop.xlane.xlu0 %473 }
 0x221   : > { %783 = vrcp.f32 %v474_v29 }
 0x227   : > { %v784_v30 = vpop.eup %783 }
 0x228   : > { %v476_v31 = vmul.f32 %v784_v30, %v782_v26 }
 0x22a   : > { %699 = vmatmul.msk.f32.vlgmr.msrb.gmra.mxu3 %vm433_vm1, %v476_v31 }
 0x2ad   : > { %v497_v32 = vpop.f32.mrf.mxu3 }
 0x2ae   : > { %500 = vxpose.xlu1.b32.start.end [1/1] (short) (narrow) %v497_v32, 8 }
 0x352   : > { %v516_v33 = vpop.trf.xlu1 }
 0x353   : > { %532 = vst.msk [vmem:[%s325_s30] sm:$0xff] %vm433_vm1, %v516_v33 }
 0x354   : > { %812 = shalt.err (!%p809_p7)
}
 0x355   : > { %708 = dma.vmem_to_hbm [thread:$0]  (%p968_p3), %s549_s8, 128, %s551_s4, %s534_s9  }
 0x356 PF: > { %p714_p9 = scmp.ge.s32.totalorder %s879_s28, 2  ;;  %s562_s18 = sand.u32 1, %s851_s21  }
 0x357   : > { %s563_s19 = scalar_lea.sflag [#allocation3], %s562_s18 }
 0x358   : > { %p711_p10 = pnand %p714_p9, %p977_p8 }
 0x35a   : > { %p712_p11 = pneg %p711_p10 }
 0x35c   : > { %846 = dma.done.wait (%p712_p11), %s563_s19, 128  }
 0x35d   : > { %848 = vsyncadd (%p712_p11), %s563_s19, 4294967168  ;;  %s19_s28 = sadd.s32 1, %s879_s28   ;;  %s1085_s10 = sld [smem:[#allocation5_spill]] }
 0x35e   : > { %p16_p12 = scmp.ge.s32.totalorder %s19_s28, 10   ;;  %s1086_s21 = smov %s855_s22 }
 0x35f   : > { %s1087_s22 = smov %s859_s23  ;;  %s1088_s23 = smov %s986_s15 }
 0x360   : > { %s1089_s24 = smov %s871_s26  ;;  %s1090_s25 = smov %s875_s27 }
 0x361   : > { %s1091_s26 = smov %s1094_s7  ;;  %18 = sbr.rel (!%p16_p12) target bundleno = 7 (0x7), region = 94 }
 0x363   : > { %s1092_s27 = smov %s1085_s10 }
 0x366   :  { %569 = vsyncpa [#allocation3], 1 }
 0x367   :  { %571 = vsyncpa [#allocation3 + $0x1], 1 }

</bundles_post_ra>
